<compile_context>
chip_gen: v7x
topology: tpu7x:2x2x1
jax: 0.10.0
libtpu: 0.0.40
codegen_flags: <defaults>
</compile_context>

<pallas_src>
import jax
import jax.numpy as jnp
from jax.experimental import pallas as pl
from jax.experimental.pallas import tpu as pltpu


def _round_up(x, m):
    return ((x + m - 1) // m) * m


def _pad2(x, rows, cols):
    r, c = x.shape
    return jnp.pad(x, ((0, rows - r), (0, cols - c)))


def _vmem_bytes(tile_b, tile_n, Fp, Ep, Cp):
    """Worst-case VMEM footprint of the pipeline (weights counted double-buffered)."""
    bf2, f4 = 2, 4
    streamed = 2 * (tile_b * tile_n * bf2      # adj  (double buffered)
                    + tile_n * Fp * bf2        # feats
                    + tile_b * Fp * bf2        # self feats
                    + tile_b * Cp * f4)        # out
    weights = 2 * (2 * Fp * Ep + Ep * Cp) * bf2
    scratch = tile_b * (Fp + Ep) * f4          # neigh accumulator + h_self
    return streamed + weights + scratch


def aegcn_kernel(adj_ref, feats_ref, self_ref, w_self_ref, w_neigh_ref,
                 w_cls_ref, out_ref, acc_ref, h_self_ref):
    k = pl.program_id(1)

    @pl.when(k == 0)
    def _():
        acc_ref[...] = jnp.zeros_like(acc_ref)
        # Hoisted out of the last-step epilogue: overlaps with the adj/feats DMAs of
        # the remaining aggregation steps instead of serializing at the end.
        h_self_ref[...] = jnp.dot(self_ref[...], w_self_ref[...],
                                  preferred_element_type=jnp.float32)

    # Mean aggregation, tiled over N: acc += adj_tile @ feats_tile (bf16 MXU, f32 acc).
    acc_ref[...] += jnp.dot(adj_ref[...], feats_ref[...],
                            preferred_element_type=jnp.float32)

    @pl.when(k == pl.num_programs(1) - 1)
    def _():
        # Encoder: relu(W_enc @ combined.T).T == relu(self @ Wself.T + neigh @ Wneigh.T),
        # with the concat eliminated by splitting W_enc (pre-transposed in the wrapper).
        neigh_bf = acc_ref[...].astype(jnp.bfloat16)
        h = h_self_ref[...] + jnp.dot(neigh_bf, w_neigh_ref[...],
                                      preferred_element_type=jnp.float32)
        h = jnp.maximum(h, 0.0)
        # scores.t() = (W_cls @ embeds).T = h @ W_cls.T  (lane-dense padded store)
        out_ref[...] = jnp.dot(h.astype(jnp.bfloat16), w_cls_ref[...],
                               preferred_element_type=jnp.float32)


def aegcn_forward(adj_norm, features, self_feats, w_enc, w_cls,
                  tile_b=None, tile_n=None, batch_blocks=1):
    B, N = adj_norm.shape
    _, F = features.shape
    E, _ = w_enc.shape
    C, _ = w_cls.shape

    # Lane dims padded to 128 (lane-dense DMAs / stores).
    Fp = _round_up(F, 128)
    Ep = _round_up(E, 128)
    Cp = _round_up(C, 128)

    # Reduction tile: large (512) to stay near the HBM roofline, multiple of 256 to
    # match the MXU contraction depth; shrunk for small graphs to avoid padding waste.
    if tile_n is None:
        tile_n = min(512, _round_up(N, 256))

    # Batch tile: pad only to the bf16 sublane requirement (16) for small B; large B
    # gets big tiles so the feature table is streamed from HBM as few times as possible.
    # `batch_blocks=2` splits the parallel axis so v7x's two TensorCores both get work.
    if tile_b is None:
        b16 = _round_up(B, 16)
        tile_b = min(256, _round_up(-(-b16 // max(batch_blocks, 1)), 16))

    # VMEM capacity (v7x: 64 MiB/TC, v5e/v6e: 128 MiB); used to bound tiles and the limit.
    try:
        vmem_cap = int(pltpu.get_tpu_info().vmem_capacity_bytes)
    except Exception:
        vmem_cap = 64 * 1024 * 1024  # conservative (v7x per-TC)

    # Shrink tiles if the pipeline would not fit comfortably in VMEM.
    while _vmem_bytes(tile_b, tile_n, Fp, Ep, Cp) > int(0.8 * vmem_cap) and tile_n > 256:
        tile_n //= 2
    while _vmem_bytes(tile_b, tile_n, Fp, Ep, Cp) > int(0.8 * vmem_cap) and tile_b > 16:
        tile_b //= 2

    Np = _round_up(N, tile_n)
    Bp = _round_up(B, tile_b)

    budget = _vmem_bytes(tile_b, tile_n, Fp, Ep, Cp)
    vmem_limit = max(2 * budget + (8 << 20), 32 << 20)
    vmem_limit = min(vmem_limit, int(0.92 * vmem_cap))

    bf = jnp.bfloat16
    adj_p = _pad2(adj_norm, Bp, Np).astype(bf)
    feats_p = _pad2(features, Np, Fp).astype(bf)
    self_p = _pad2(self_feats, Bp, Fp).astype(bf)
    # Split + pre-transpose encoder weight; pre-transpose classifier weight (trace-time).
    w_self_t = _pad2(w_enc[:, :F].T, Fp, Ep).astype(bf)    # (Fp, Ep)
    w_neigh_t = _pad2(w_enc[:, F:].T, Fp, Ep).astype(bf)   # (Fp, Ep)
    w_cls_t = _pad2(w_cls.T, Ep, Cp).astype(bf)            # (Ep, Cp)

    grid = (Bp // tile_b, Np // tile_n)

    def _build(single_buffer_weights):
        if single_buffer_weights:
            # Resident weights: single pipeline buffer (no dead second buffer).
            def w_spec(shape):
                return pl.BlockSpec(shape, lambda i, k: (0, 0),
                                    pipeline_mode=pl.Buffered(1))
        else:
            def w_spec(shape):
                return pl.BlockSpec(shape, lambda i, k: (0, 0))

        return pl.pallas_call(
            aegcn_kernel,
            out_shape=jax.ShapeDtypeStruct((Bp, Cp), jnp.float32),
            grid_spec=pltpu.PrefetchScalarGridSpec(
                num_scalar_prefetch=0,
                grid=grid,
                in_specs=[
                    pl.BlockSpec((tile_b, tile_n), lambda i, k: (i, k)),  # adj
                    pl.BlockSpec((tile_n, Fp), lambda i, k: (k, 0)),      # features
                    pl.BlockSpec((tile_b, Fp), lambda i, k: (i, 0)),      # self feats
                    w_spec((Fp, Ep)),                                     # w_self_t
                    w_spec((Fp, Ep)),                                     # w_neigh_t
                    w_spec((Ep, Cp)),                                     # w_cls_t
                ],
                out_specs=pl.BlockSpec((tile_b, Cp), lambda i, k: (i, 0)),
                scratch_shapes=[pltpu.VMEM((tile_b, Fp), jnp.float32),    # neigh acc
                                pltpu.VMEM((tile_b, Ep), jnp.float32)],   # h_self
            ),
            compiler_params=pltpu.CompilerParams(
                dimension_semantics=("parallel", "arbitrary"),
                vmem_limit_bytes=vmem_limit,
            ),
        )

    args = (adj_p, feats_p, self_p, w_self_t, w_neigh_t, w_cls_t)
    try:
        out_p = _build(single_buffer_weights=True)(*args)
    except Exception:
        # Fallback if this JAX/Mosaic version rejects Buffered(1) for constant blocks.
        out_p = _build(single_buffer_weights=False)(*args)

    # NOTE: when E < F at production scale, pre-projecting the feature table once
    # (feats @ w_neigh_t) and aggregating in E-space further cuts HBM traffic; not
    # applied here since the demo has E == F.
    return out_p[:B, :C]


def xavier_normal(key, shape):
    fan_out, fan_in = shape
    std = (2.0 / (fan_in + fan_out)) ** 0.5
    return std * jax.random.normal(key, shape, dtype=jnp.float32)


if __name__ == "__main__":
    # Small, deterministic synthetic problem.
    N_total = 64   # total nodes in graph
    F_dim   = 32   # raw feature dim
    E_dim   = 32   # encoder embedding dim
    C_cls   = 8    # num_classes
    B       = 16   # batch of nodes

    key = jax.random.PRNGKey(0)
    k_feat, k_adj, k_enc, k_cls = jax.random.split(key, 4)

    # Node feature table.
    features = jax.random.normal(k_feat, (N_total, F_dim), dtype=jnp.float32)

    # Batch of node ids and their self features (gather = glue, outside kernel).
    nodes = jnp.arange(B, dtype=jnp.int32)
    self_feats = features[nodes]

    # Deterministic random adjacency; row-normalize (mean aggregator).
    adj_raw = (jax.random.uniform(k_adj, (B, N_total)) < 0.25).astype(jnp.float32)
    adj_raw = adj_raw.at[:, 0].set(1.0)  # ensure no empty neighborhoods
    adj_norm = adj_raw / jnp.sum(adj_raw, axis=1, keepdims=True)

    # Parameters (xavier_normal, matching torch init.xavier_normal shapes).
    w_enc = xavier_normal(k_enc, (E_dim, 2 * F_dim))   # encoder.weight
    w_cls = xavier_normal(k_cls, (C_cls, E_dim))       # AggEncGCN.weight

    out = aegcn_forward(adj_norm, features, self_feats, w_enc, w_cls)
    out = jax.block_until_ready(out)
    assert out.shape == (B, C_cls)

    # Reference 1: same bf16 casts / f32 accumulation as the kernel (tight tolerance).
    f32 = jnp.float32
    adj_b = adj_norm.astype(jnp.bfloat16).astype(f32)
    feats_b = features.astype(jnp.bfloat16).astype(f32)
    self_b = self_feats.astype(jnp.bfloat16).astype(f32)
    w_enc_b = w_enc.astype(jnp.bfloat16).astype(f32)
    w_cls_b = w_cls.astype(jnp.bfloat16).astype(f32)

    neigh = adj_b @ feats_b
    neigh_q = neigh.astype(jnp.bfloat16).astype(f32)
    h_ref = self_b @ w_enc_b[:, :F_dim].T + neigh_q @ w_enc_b[:, F_dim:].T
    h_ref = jnp.maximum(h_ref, 0.0).astype(jnp.bfloat16).astype(f32)
    scores_bf_ref = h_ref @ w_cls_b.T
    assert jnp.allclose(out, scores_bf_ref, atol=2e-4, rtol=2e-4)

    # Reference 2: pure-f32 PyTorch forward (loose tolerance due to bf16 inputs).
    neigh_f = adj_norm @ features
    combined_f = jnp.concatenate([self_feats, neigh_f], axis=1)
    embeds_f = jnp.maximum(w_enc @ combined_f.T, 0.0)   # (E, B)
    scores_f = (w_cls @ embeds_f).T                     # (B, C)
    assert jnp.allclose(out, scores_f, atol=5e-2, rtol=5e-2)

    # TODO(synk): CrossEntropyLoss (AggEncGCN.loss) is not part of forward(); not kernelized.
    print("KERNEL_OK")
</pallas_src>

<mosaic_0001>
module attributes {stable_mosaic.version = 11 : i64} {
  func.func @aegcn_kernel(%arg0: i32, %arg1: i32, %arg2: memref<16x256xbf16, #tpu.memory_space<vmem>>, %arg3: memref<256x128xbf16, #tpu.memory_space<vmem>>, %arg4: memref<16x128xbf16, #tpu.memory_space<vmem>>, %arg5: memref<128x128xbf16, #tpu.memory_space<vmem>>, %arg6: memref<128x128xbf16, #tpu.memory_space<vmem>>, %arg7: memref<128x128xbf16, #tpu.memory_space<vmem>>, %arg8: memref<16x128xf32, #tpu.memory_space<vmem>>, %arg9: memref<16x128xf32, #tpu.memory_space<vmem>>, %arg10: memref<16x128xf32, #tpu.memory_space<vmem>>) attributes {dimension_semantics = [#tpu.dimension_semantics<parallel>, #tpu.dimension_semantics<arbitrary>], iteration_bounds = array<i64: 1, 1>, scalar_prefetch = 0 : i64, scratch_operands = 2 : i64, tpu.core_type = #tpu.core_type<tc>, window_params = [{transform_indices = @transform_0, window_bounds = array<i64: 16, 256>}, {transform_indices = @transform_1, window_bounds = array<i64: 256, 128>}, {transform_indices = @transform_2, window_bounds = array<i64: 16, 128>}, {pipeline_mode = #tpu.pipeline_mode<synchronous>, transform_indices = @transform_3, window_bounds = array<i64: 128, 128>}, {pipeline_mode = #tpu.pipeline_mode<synchronous>, transform_indices = @transform_4, window_bounds = array<i64: 128, 128>}, {pipeline_mode = #tpu.pipeline_mode<synchronous>, transform_indices = @transform_5, window_bounds = array<i64: 128, 128>}, {transform_indices = @transform_6, window_bounds = array<i64: 16, 128>}]} {
    %c0_i32 = arith.constant 0 : i32
    %0 = arith.cmpi eq, %arg1, %c0_i32 : i32
    %1 = arith.extui %0 : i1 to i32
    %c0_i32_0 = arith.constant 0 : i32
    %2 = arith.cmpi ne, %1, %c0_i32_0 : i32
    scf.if %2 {
      %cst_10 = arith.constant 0.000000e+00 : f32
      %12 = vector.broadcast %cst_10 : f32 to vector<16x128xf32>
      %c0_11 = arith.constant 0 : index
      %c0_12 = arith.constant 0 : index
      %13 = vector.load %arg9[%c0_11, %c0_12] : memref<16x128xf32, #tpu.memory_space<vmem>>, vector<16x128xf32>
      tpu.vector_store %arg9[%c0_11, %c0_12], %12 {strides = array<i32>} : memref<16x128xf32, #tpu.memory_space<vmem>>, vector<16x128xf32>,
      %c0_13 = arith.constant 0 : index
      %c0_14 = arith.constant 0 : index
      %14 = vector.load %arg4[%c0_13, %c0_14] : memref<16x128xbf16, #tpu.memory_space<vmem>>, vector<16x128xbf16>
      %c0_15 = arith.constant 0 : index
      %c0_16 = arith.constant 0 : index
      %15 = vector.load %arg5[%c0_15, %c0_16] : memref<128x128xbf16, #tpu.memory_space<vmem>>, vector<128x128xbf16>
      %cst_17 = arith.constant dense<0.000000e+00> : vector<16x128xf32>
      %16 = tpu.matmul %14, %15, %cst_17 {dimension_numbers = #tpu.dot_dimension_numbers<[1], [0], [0], [1], [0, 0, 1, 1], [], []>} : vector<16x128xbf16>, vector<128x128xbf16>, vector<16x128xf32> -> vector<16x128xf32>
      %c0_18 = arith.constant 0 : index
      %c0_19 = arith.constant 0 : index
      %17 = vector.load %arg10[%c0_18, %c0_19] : memref<16x128xf32, #tpu.memory_space<vmem>>, vector<16x128xf32>
      tpu.vector_store %arg10[%c0_18, %c0_19], %16 {strides = array<i32>} : memref<16x128xf32, #tpu.memory_space<vmem>>, vector<16x128xf32>,
    } else {
    }
    %c0 = arith.constant 0 : index
    %c0_1 = arith.constant 0 : index
    %3 = vector.load %arg9[%c0, %c0_1] : memref<16x128xf32, #tpu.memory_space<vmem>>, vector<16x128xf32>
    %c0_2 = arith.constant 0 : index
    %c0_3 = arith.constant 0 : index
    %4 = vector.load %arg2[%c0_2, %c0_3] : memref<16x256xbf16, #tpu.memory_space<vmem>>, vector<16x256xbf16>
    %c0_4 = arith.constant 0 : index
    %c0_5 = arith.constant 0 : index
    %5 = vector.load %arg3[%c0_4, %c0_5] : memref<256x128xbf16, #tpu.memory_space<vmem>>, vector<256x128xbf16>
    %cst = arith.constant dense<0.000000e+00> : vector<16x128xf32>
    %6 = tpu.matmul %4, %5, %cst {dimension_numbers = #tpu.dot_dimension_numbers<[1], [0], [0], [1], [0, 0, 1, 1], [], []>} : vector<16x256xbf16>, vector<256x128xbf16>, vector<16x128xf32> -> vector<16x128xf32>
    %7 = arith.addf %3, %6 : vector<16x128xf32>
    %c0_6 = arith.constant 0 : index
    %c0_7 = arith.constant 0 : index
    %8 = vector.load %arg9[%c0_6, %c0_7] : memref<16x128xf32, #tpu.memory_space<vmem>>, vector<16x128xf32>
    tpu.vector_store %arg9[%c0_6, %c0_7], %7 {strides = array<i32>} : memref<16x128xf32, #tpu.memory_space<vmem>>, vector<16x128xf32>,
    %c0_i32_8 = arith.constant 0 : i32
    %9 = arith.cmpi eq, %arg1, %c0_i32_8 : i32
    %10 = arith.extui %9 : i1 to i32
    %c0_i32_9 = arith.constant 0 : i32
    %11 = arith.cmpi ne, %10, %c0_i32_9 : i32
    scf.if %11 {
      %c0_10 = arith.constant 0 : index
      %c0_11 = arith.constant 0 : index
      %12 = vector.load %arg9[%c0_10, %c0_11] : memref<16x128xf32, #tpu.memory_space<vmem>>, vector<16x128xf32>
      %13 = arith.truncf %12 : vector<16x128xf32> to vector<16x128xbf16>
      %c0_12 = arith.constant 0 : index
      %c0_13 = arith.constant 0 : index
      %14 = vector.load %arg10[%c0_12, %c0_13] : memref<16x128xf32, #tpu.memory_space<vmem>>, vector<16x128xf32>
      %c0_14 = arith.constant 0 : index
      %c0_15 = arith.constant 0 : index
      %15 = vector.load %arg6[%c0_14, %c0_15] : memref<128x128xbf16, #tpu.memory_space<vmem>>, vector<128x128xbf16>
      %cst_16 = arith.constant dense<0.000000e+00> : vector<16x128xf32>
      %16 = tpu.matmul %13, %15, %cst_16 {dimension_numbers = #tpu.dot_dimension_numbers<[1], [0], [0], [1], [0, 0, 1, 1], [], []>} : vector<16x128xbf16>, vector<128x128xbf16>, vector<16x128xf32> -> vector<16x128xf32>
      %17 = arith.addf %14, %16 : vector<16x128xf32>
      %cst_17 = arith.constant 0.000000e+00 : f32
      %18 = vector.broadcast %cst_17 : f32 to vector<16x128xf32>
      %19 = arith.maximumf %17, %18 : vector<16x128xf32>
      %20 = arith.truncf %19 : vector<16x128xf32> to vector<16x128xbf16>
      %c0_18 = arith.constant 0 : index
      %c0_19 = arith.constant 0 : index
      %21 = vector.load %arg7[%c0_18, %c0_19] : memref<128x128xbf16, #tpu.memory_space<vmem>>, vector<128x128xbf16>
      %cst_20 = arith.constant dense<0.000000e+00> : vector<16x128xf32>
      %22 = tpu.matmul %20, %21, %cst_20 {dimension_numbers = #tpu.dot_dimension_numbers<[1], [0], [0], [1], [0, 0, 1, 1], [], []>} : vector<16x128xbf16>, vector<128x128xbf16>, vector<16x128xf32> -> vector<16x128xf32>
      %c0_21 = arith.constant 0 : index
      %c0_22 = arith.constant 0 : index
      %23 = vector.load %arg8[%c0_21, %c0_22] : memref<16x128xf32, #tpu.memory_space<vmem>>, vector<16x128xf32>
      tpu.vector_store %arg8[%c0_21, %c0_22], %22 {strides = array<i32>} : memref<16x128xf32, #tpu.memory_space<vmem>>, vector<16x128xf32>,
    } else {
    }
    return
  }
  func.func @transform_0(%arg0: i32, %arg1: i32) -> (i32, i32) {
    %c0_i32 = arith.constant 0 : i32
    return %arg0, %arg1 : i32, i32
  }
  func.func @transform_1(%arg0: i32, %arg1: i32) -> (i32, i32) {
    %c0_i32 = arith.constant 0 : i32
    %c0_i32_0 = arith.constant 0 : i32
    return %arg1, %c0_i32 : i32, i32
  }
  func.func @transform_2(%arg0: i32, %arg1: i32) -> (i32, i32) {
    %c0_i32 = arith.constant 0 : i32
    %c0_i32_0 = arith.constant 0 : i32
    return %arg0, %c0_i32 : i32, i32
  }
  func.func @transform_3(%arg0: i32, %arg1: i32) -> (i32, i32) {
    %c0_i32 = arith.constant 0 : i32
    %c0_i32_0 = arith.constant 0 : i32
    %c0_i32_1 = arith.constant 0 : i32
    return %c0_i32, %c0_i32_0 : i32, i32
  }
  func.func @transform_4(%arg0: i32, %arg1: i32) -> (i32, i32) {
    %c0_i32 = arith.constant 0 : i32
    %c0_i32_0 = arith.constant 0 : i32
    %c0_i32_1 = arith.constant 0 : i32
    return %c0_i32, %c0_i32_0 : i32, i32
  }
  func.func @transform_5(%arg0: i32, %arg1: i32) -> (i32, i32) {
    %c0_i32 = arith.constant 0 : i32
    %c0_i32_0 = arith.constant 0 : i32
    %c0_i32_1 = arith.constant 0 : i32
    return %c0_i32, %c0_i32_0 : i32, i32
  }
  func.func @transform_6(%arg0: i32, %arg1: i32) -> (i32, i32) {
    %c0_i32 = arith.constant 0 : i32
    %c0_i32_0 = arith.constant 0 : i32
    return %arg0, %c0_i32 : i32, i32
  }
}

module attributes {stable_mosaic.version = 11 : i64} {
  func.func @aegcn_kernel(%arg0: i32, %arg1: i32, %arg2: memref<16x256xbf16, #tpu.memory_space<vmem>>, %arg3: memref<256x128xbf16, #tpu.memory_space<vmem>>, %arg4: memref<16x128xbf16, #tpu.memory_space<vmem>>, %arg5: memref<128x128xbf16, #tpu.memory_space<vmem>>, %arg6: memref<128x128xbf16, #tpu.memory_space<vmem>>, %arg7: memref<128x128xbf16, #tpu.memory_space<vmem>>, %arg8: memref<16x128xf32, #tpu.memory_space<vmem>>, %arg9: memref<16x128xf32, #tpu.memory_space<vmem>>, %arg10: memref<16x128xf32, #tpu.memory_space<vmem>>) attributes {dimension_semantics = [#tpu.dimension_semantics<parallel>, #tpu.dimension_semantics<arbitrary>], iteration_bounds = array<i64: 1, 1>, scalar_prefetch = 0 : i64, scratch_operands = 2 : i64, tpu.core_type = #tpu.core_type<tc>, window_params = [{transform_indices = @transform_0, window_bounds = array<i64: 16, 256>}, {transform_indices = @transform_1, window_bounds = array<i64: 256, 128>}, {transform_indices = @transform_2, window_bounds = array<i64: 16, 128>}, {pipeline_mode = #tpu.pipeline_mode<synchronous>, transform_indices = @transform_3, window_bounds = array<i64: 128, 128>}, {pipeline_mode = #tpu.pipeline_mode<synchronous>, transform_indices = @transform_4, window_bounds = array<i64: 128, 128>}, {pipeline_mode = #tpu.pipeline_mode<synchronous>, transform_indices = @transform_5, window_bounds = array<i64: 128, 128>}, {transform_indices = @transform_6, window_bounds = array<i64: 16, 128>}]} {
    %c0_i32 = arith.constant 0 : i32
    %0 = arith.cmpi eq, %arg1, %c0_i32 : i32
    %1 = arith.extui %0 : i1 to i32
    %c0_i32_0 = arith.constant 0 : i32
    %2 = arith.cmpi ne, %1, %c0_i32_0 : i32
    scf.if %2 {
      %cst_10 = arith.constant 0.000000e+00 : f32
      %12 = vector.broadcast %cst_10 : f32 to vector<16x128xf32>
      %c0_11 = arith.constant 0 : index
      %c0_12 = arith.constant 0 : index
      %13 = vector.load %arg9[%c0_11, %c0_12] : memref<16x128xf32, #tpu.memory_space<vmem>>, vector<16x128xf32>
      tpu.vector_store %arg9[%c0_11, %c0_12], %12 {strides = array<i32>} : memref<16x128xf32, #tpu.memory_space<vmem>>, vector<16x128xf32>,
      %c0_13 = arith.constant 0 : index
      %c0_14 = arith.constant 0 : index
      %14 = vector.load %arg4[%c0_13, %c0_14] : memref<16x128xbf16, #tpu.memory_space<vmem>>, vector<16x128xbf16>
      %c0_15 = arith.constant 0 : index
      %c0_16 = arith.constant 0 : index
      %15 = vector.load %arg5[%c0_15, %c0_16] : memref<128x128xbf16, #tpu.memory_space<vmem>>, vector<128x128xbf16>
      %cst_17 = arith.constant dense<0.000000e+00> : vector<16x128xf32>
      %16 = tpu.matmul %14, %15, %cst_17 {dimension_numbers = #tpu.dot_dimension_numbers<[1], [0], [0], [1], [0, 0, 1, 1], [], []>} : vector<16x128xbf16>, vector<128x128xbf16>, vector<16x128xf32> -> vector<16x128xf32>
      %c0_18 = arith.constant 0 : index
      %c0_19 = arith.constant 0 : index
      %17 = vector.load %arg10[%c0_18, %c0_19] : memref<16x128xf32, #tpu.memory_space<vmem>>, vector<16x128xf32>
      tpu.vector_store %arg10[%c0_18, %c0_19], %16 {strides = array<i32>} : memref<16x128xf32, #tpu.memory_space<vmem>>, vector<16x128xf32>,
    } else {
    }
    %c0 = arith.constant 0 : index
    %c0_1 = arith.constant 0 : index
    %3 = vector.load %arg9[%c0, %c0_1] : memref<16x128xf32, #tpu.memory_space<vmem>>, vector<16x128xf32>
    %c0_2 = arith.constant 0 : index
    %c0_3 = arith.constant 0 : index
    %4 = vector.load %arg2[%c0_2, %c0_3] : memref<16x256xbf16, #tpu.memory_space<vmem>>, vector<16x256xbf16>
    %c0_4 = arith.constant 0 : index
    %c0_5 = arith.constant 0 : index
    %5 = vector.load %arg3[%c0_4, %c0_5] : memref<256x128xbf16, #tpu.memory_space<vmem>>, vector<256x128xbf16>
    %cst = arith.constant dense<0.000000e+00> : vector<16x128xf32>
    %6 = tpu.matmul %4, %5, %cst {dimension_numbers = #tpu.dot_dimension_numbers<[1], [0], [0], [1], [0, 0, 1, 1], [], []>} : vector<16x256xbf16>, vector<256x128xbf16>, vector<16x128xf32> -> vector<16x128xf32>
    %7 = arith.addf %3, %6 : vector<16x128xf32>
    %c0_6 = arith.constant 0 : index
    %c0_7 = arith.constant 0 : index
    %8 = vector.load %arg9[%c0_6, %c0_7] : memref<16x128xf32, #tpu.memory_space<vmem>>, vector<16x128xf32>
    tpu.vector_store %arg9[%c0_6, %c0_7], %7 {strides = array<i32>} : memref<16x128xf32, #tpu.memory_space<vmem>>, vector<16x128xf32>,
    %c0_i32_8 = arith.constant 0 : i32
    %9 = arith.cmpi eq, %arg1, %c0_i32_8 : i32
    %10 = arith.extui %9 : i1 to i32
    %c0_i32_9 = arith.constant 0 : i32
    %11 = arith.cmpi ne, %10, %c0_i32_9 : i32
    scf.if %11 {
      %c0_10 = arith.constant 0 : index
      %c0_11 = arith.constant 0 : index
      %12 = vector.load %arg9[%c0_10, %c0_11] : memref<16x128xf32, #tpu.memory_space<vmem>>, vector<16x128xf32>
      %13 = arith.truncf %12 : vector<16x128xf32> to vector<16x128xbf16>
      %c0_12 = arith.constant 0 : index
      %c0_13 = arith.constant 0 : index
      %14 = vector.load %arg10[%c0_12, %c0_13] : memref<16x128xf32, #tpu.memory_space<vmem>>, vector<16x128xf32>
      %c0_14 = arith.constant 0 : index
      %c0_15 = arith.constant 0 : index
      %15 = vector.load %arg6[%c0_14, %c0_15] : memref<128x128xbf16, #tpu.memory_space<vmem>>, vector<128x128xbf16>
      %cst_16 = arith.constant dense<0.000000e+00> : vector<16x128xf32>
      %16 = tpu.matmul %13, %15, %cst_16 {dimension_numbers = #tpu.dot_dimension_numbers<[1], [0], [0], [1], [0, 0, 1, 1], [], []>} : vector<16x128xbf16>, vector<128x128xbf16>, vector<16x128xf32> -> vector<16x128xf32>
      %17 = arith.addf %14, %16 : vector<16x128xf32>
      %cst_17 = arith.constant 0.000000e+00 : f32
      %18 = vector.broadcast %cst_17 : f32 to vector<16x128xf32>
      %19 = arith.maximumf %17, %18 : vector<16x128xf32>
      %20 = arith.truncf %19 : vector<16x128xf32> to vector<16x128xbf16>
      %c0_18 = arith.constant 0 : index
      %c0_19 = arith.constant 0 : index
      %21 = vector.load %arg7[%c0_18, %c0_19] : memref<128x128xbf16, #tpu.memory_space<vmem>>, vector<128x128xbf16>
      %cst_20 = arith.constant dense<0.000000e+00> : vector<16x128xf32>
      %22 = tpu.matmul %20, %21, %cst_20 {dimension_numbers = #tpu.dot_dimension_numbers<[1], [0], [0], [1], [0, 0, 1, 1], [], []>} : vector<16x128xbf16>, vector<128x128xbf16>, vector<16x128xf32> -> vector<16x128xf32>
      %c0_21 = arith.constant 0 : index
      %c0_22 = arith.constant 0 : index
      %23 = vector.load %arg8[%c0_21, %c0_22] : memref<16x128xf32, #tpu.memory_space<vmem>>, vector<16x128xf32>
      tpu.vector_store %arg8[%c0_21, %c0_22], %22 {strides = array<i32>} : memref<16x128xf32, #tpu.memory_space<vmem>>, vector<16x128xf32>,
    } else {
    }
    return
  }
  func.func @transform_0(%arg0: i32, %arg1: i32) -> (i32, i32) {
    %c0_i32 = arith.constant 0 : i32
    return %arg0, %arg1 : i32, i32
  }
  func.func @transform_1(%arg0: i32, %arg1: i32) -> (i32, i32) {
    %c0_i32 = arith.constant 0 : i32
    %c0_i32_0 = arith.constant 0 : i32
    return %arg1, %c0_i32 : i32, i32
  }
  func.func @transform_2(%arg0: i32, %arg1: i32) -> (i32, i32) {
    %c0_i32 = arith.constant 0 : i32
    %c0_i32_0 = arith.constant 0 : i32
    return %arg0, %c0_i32 : i32, i32
  }
  func.func @transform_3(%arg0: i32, %arg1: i32) -> (i32, i32) {
    %c0_i32 = arith.constant 0 : i32
    %c0_i32_0 = arith.constant 0 : i32
    %c0_i32_1 = arith.constant 0 : i32
    return %c0_i32, %c0_i32_0 : i32, i32
  }
  func.func @transform_4(%arg0: i32, %arg1: i32) -> (i32, i32) {
    %c0_i32 = arith.constant 0 : i32
    %c0_i32_0 = arith.constant 0 : i32
    %c0_i32_1 = arith.constant 0 : i32
    return %c0_i32, %c0_i32_0 : i32, i32
  }
  func.func @transform_5(%arg0: i32, %arg1: i32) -> (i32, i32) {
    %c0_i32 = arith.constant 0 : i32
    %c0_i32_0 = arith.constant 0 : i32
    %c0_i32_1 = arith.constant 0 : i32
    return %c0_i32, %c0_i32_0 : i32, i32
  }
  func.func @transform_6(%arg0: i32, %arg1: i32) -> (i32, i32) {
    %c0_i32 = arith.constant 0 : i32
    %c0_i32_0 = arith.constant 0 : i32
    return %arg0, %c0_i32 : i32, i32
  }
}

</mosaic_0001>

<bundles_post_ra>
// kernel: tpu_custom_call.1
= control target key start
LH: loop header
LB: loop body
LE: loop exit
PB: predicated region body
PF: predicated region fallthrough
CT: control target
= control target key end

     0   :  { %11 = vsyncpa [#allocation5], 0  ;;  %s1220_s0 = inlined_call_operand.hbm [shape: bf16[16,256], index: 0, kind: input, shape index: {}]   ;;  %s1221_s1 = inlined_call_operand.hbm [shape: bf16[256,128], index: 1, kind: input, shape index: {}]   ;;  %s1222_s2 = inlined_call_operand.hbm [shape: bf16[16,128], index: 2, kind: input, shape index: {}]   ;;  %s1223_s3 = inlined_call_operand.hbm [shape: bf16[128,128], index: 3, kind: input, shape index: {}]   ;;  %s1224_s4 = inlined_call_operand.hbm [shape: bf16[128,128], index: 4, kind: input, shape index: {}]   ;;  %s1225_s5 = inlined_call_operand.hbm [shape: bf16[128,128], index: 5, kind: input, shape index: {}]   ;;  %s1226_s6 = inlined_call_operand.hbm [shape: f32[16,128], index: 6, kind: output, shape index: {}]  }
   0x1   :  { %12 = vsyncpa [#allocation8], 0 }
   0x2   :  { %13 = vsyncpa [#allocation11], 0 }
   0x3   :  { %14 = vsyncpa [#allocation14], 0 }
   0x4   :  { %15 = vsyncpa [#allocation6], 0  ;;  %s1037_s21 = smov [#allocation7]   ;;  %s873_s25 = scalar_lea.hbm %s1221_s1, 2048 }
   0x5   :  { %s33_s22 = sshll.u32 %s1037_s21, 4  ;;  %p874_p0 = scmp.ne.s32.totalorder %s1221_s1, %s873_s25  ;;  %s34_s22 = int_to_ptr.vmem [resolvable:$true] %s33_s22 }
   0x6   :  { %p877_p1 = scmp.lt.u32.totalorder %s873_s25, %s1221_s1 }
   0x8   :  { %p879_p2 = pnand %p877_p1, %p874_p0 }
   0xa   :  { %882 = shalt.err (!%p879_p2)
}
   0xb   :  { %s883_s30 = scalar_lea.vmem %s34_s22, 2048  ;;  %p888_p4 = scmp.lt.s32.totalorder %s34_s22, %s34_s22 }
   0xc   :  { %p884_p3 = scmp.ne.s32.totalorder %s34_s22, %s883_s30  ;;  %p889_p5 = scmp.lt.s32.totalorder %s883_s30, %s883_s30 }
   0xe   :  { %p890_p6 = por %p889_p5, %p888_p4 }
  0x10   :  { %p891_p7 = pnand %p890_p6, %p884_p3 }
  0x12   :  { %894 = shalt.err (!%p891_p7)
}
  0x13   :  { %s1038_s7 = smov 64   ;;  %s1039_s8 = smov 4  }
  0x14   :  { %39 = dma.hbm_to_vmem [thread:$0]  %s1221_s1, 2048, %s34_s22, [#allocation8], %s1038_s7, %s1038_s7, %s1039_s8  }
  0x15   :  { %s1040_s11 = smov [#allocation10]   ;;  %s1041_s13 = smov [#allocation4]  }
  0x16   :  { %s57_s12 = sshll.u32 %s1040_s11, 4  ;;  %s21_s14 = sshll.u32 %s1041_s13, 4  ;;  %s58_s12 = int_to_ptr.vmem [resolvable:$true] %s57_s12  ;;  %s22_s14 = int_to_ptr.vmem [resolvable:$true] %s21_s14 }
  0x17   :  { %s895_s17 = scalar_lea.hbm %s1223_s3, 1024 }
  0x18   :  { %p896_p8 = scmp.ne.s32.totalorder %s1223_s3, %s895_s17  ;;  %p899_p9 = scmp.lt.u32.totalorder %s895_s17, %s1223_s3 }
  0x1a   :  { %p901_p10 = pnand %p899_p9, %p896_p8 }
  0x1c   :  { %904 = shalt.err (!%p901_p10)
}
  0x1d   :  { %s905_s1 = scalar_lea.vmem %s58_s12, 1024  ;;  %p910_p12 = scmp.lt.s32.totalorder %s58_s12, %s58_s12 }
  0x1e   :  { %p906_p11 = scmp.ne.s32.totalorder %s58_s12, %s905_s1  ;;  %p911_p13 = scmp.lt.s32.totalorder %s905_s1, %s905_s1 }
  0x20   :  { %p912_p0 = por %p911_p13, %p910_p12 }
  0x22   :  { %p913_p1 = pnand %p912_p0, %p906_p11 }
  0x24   :  { %916 = shalt.err (!%p913_p1)
}
  0x25   :  { %63 = dma.hbm_to_vmem [thread:$0]  %s1223_s3, 1024, %s58_s12, [#allocation11], %s1038_s7, %s1038_s7, %s1039_s8  }
  0x26   :  { %s917_s26 = scalar_lea.hbm %s1220_s0, 256 }
  0x27   :  { %p918_p2 = scmp.ne.s32.totalorder %s1220_s0, %s917_s26  ;;  %p921_p3 = scmp.lt.u32.totalorder %s917_s26, %s1220_s0 }
  0x29   :  { %p923_p4 = pnand %p921_p3, %p918_p2 }
  0x2b   :  { %926 = shalt.err (!%p923_p4)
}
  0x2c   :  { %s927_s9 = scalar_lea.vmem %s22_s14, 256  ;;  %p932_p6 = scmp.lt.s32.totalorder %s22_s14, %s22_s14 }
  0x2d   :  { %p928_p5 = scmp.ne.s32.totalorder %s22_s14, %s927_s9  ;;  %p933_p7 = scmp.lt.s32.totalorder %s927_s9, %s927_s9 }
  0x2f   :  { %p934_p8 = por %p933_p7, %p932_p6 }
  0x31   :  { %p935_p9 = pnand %p934_p8, %p928_p5 }
  0x33   :  { %938 = shalt.err (!%p935_p9)
}
  0x34   :  { %s1042_s3 = smov 128   ;;  %s1043_s10 = smov 8  }
  0x35   :  { %27 = dma.hbm_to_vmem [thread:$0]  %s1220_s0, 256, %s22_s14, [#allocation5], %s1042_s3, %s1042_s3, %s1043_s10  }
  0x36   :  { %s1044_s13 = smov [#allocation9]   ;;  %s1045_s16 = smov [#allocation12]  }
  0x37   :  { %s45_s15 = sshll.u32 %s1044_s13, 4  ;;  %s69_s17 = sshll.u32 %s1045_s16, 4  ;;  %s46_s15 = int_to_ptr.vmem [resolvable:$true] %s45_s15  ;;  %s70_s17 = int_to_ptr.vmem [resolvable:$true] %s69_s17 }
  0x38   :  { %s939_s20 = scalar_lea.hbm %s1222_s2, 128 }
  0x39   :  { %p940_p10 = scmp.ne.s32.totalorder %s1222_s2, %s939_s20  ;;  %p943_p11 = scmp.lt.u32.totalorder %s939_s20, %s1222_s2 }
  0x3b   :  { %p945_p12 = pnand %p943_p11, %p940_p10 }
  0x3d   :  { %948 = shalt.err (!%p945_p12)
}
  0x3e   :  { %s949_s0 = scalar_lea.vmem %s46_s15, 128  ;;  %p954_p0 = scmp.lt.s32.totalorder %s46_s15, %s46_s15 }
  0x3f   :  { %p950_p13 = scmp.ne.s32.totalorder %s46_s15, %s949_s0  ;;  %p955_p1 = scmp.lt.s32.totalorder %s949_s0, %s949_s0 }
  0x41   :  { %p956_p2 = por %p955_p1, %p954_p0 }
  0x43   :  { %p957_p3 = pnand %p956_p2, %p950_p13 }
  0x45   :  { %960 = shalt.err (!%p957_p3)
}
  0x46   :  { %51 = dma.hbm_to_vmem [thread:$0]  %s1222_s2, 128, %s46_s15, [#allocation8], %s1038_s7, %s1038_s7, %s1039_s8  }
  0x47   :  { %s961_s27 = scalar_lea.hbm %s1224_s4, 1024 }
  0x48   :  { %p962_p4 = scmp.ne.s32.totalorder %s1224_s4, %s961_s27  ;;  %p965_p5 = scmp.lt.u32.totalorder %s961_s27, %s1224_s4 }
  0x4a   :  { %p967_p6 = pnand %p965_p5, %p962_p4 }
  0x4c   :  { %970 = shalt.err (!%p967_p6)
}
  0x4d   :  { %s971_s11 = scalar_lea.vmem %s70_s17, 1024  ;;  %p976_p8 = scmp.lt.s32.totalorder %s70_s17, %s70_s17 }
  0x4e   :  { %p972_p7 = scmp.ne.s32.totalorder %s70_s17, %s971_s11  ;;  %p977_p9 = scmp.lt.s32.totalorder %s971_s11, %s971_s11 }
  0x50   :  { %p978_p10 = por %p977_p9, %p976_p8 }
  0x52   :  { %p979_p11 = pnand %p978_p10, %p972_p7 }
  0x54   :  { %982 = shalt.err (!%p979_p11)
}
  0x55   :  { %75 = dma.hbm_to_vmem [thread:$0]  %s1224_s4, 1024, %s70_s17, [#allocation11], %s1038_s7, %s1038_s7, %s1039_s8  }
  0x56   :  { %s1046_s13 = smov [#allocation13]   ;;  %s983_s19 = scalar_lea.hbm %s1225_s5, 1024 }
  0x57   :  { %s81_s15 = sshll.u32 %s1046_s13, 4  ;;  %p984_p12 = scmp.ne.s32.totalorder %s1225_s5, %s983_s19  ;;  %s82_s15 = int_to_ptr.vmem [resolvable:$true] %s81_s15 }
  0x58   :  { %p987_p13 = scmp.lt.u32.totalorder %s983_s19, %s1225_s5 }
  0x5a   :  { %p989_p0 = pnand %p987_p13, %p984_p12 }
  0x5c   :  { %992 = shalt.err (!%p989_p0)
}
  0x5d   :  { %s993_s23 = scalar_lea.vmem %s82_s15, 1024  ;;  %p998_p2 = scmp.lt.s32.totalorder %s82_s15, %s82_s15 }
  0x5e   :  { %p994_p1 = scmp.ne.s32.totalorder %s82_s15, %s993_s23  ;;  %p999_p3 = scmp.lt.s32.totalorder %s993_s23, %s993_s23 }
  0x60   :  { %p1000_p4 = por %p999_p3, %p998_p2 }
  0x62   :  { %p1001_p5 = pnand %p1000_p4, %p994_p1 }
  0x64   :  { %1004 = shalt.err (!%p1001_p5)
}
  0x65   :  { %87 = dma.hbm_to_vmem [thread:$0]  %s1225_s5, 1024, %s82_s15, [#allocation14], %s1038_s7, %s1038_s7, %s1039_s8  }
  0x66   :  { %1027 = dma.done.wait [#allocation5], 256  }
  0x67   :  { %1028 = vsyncadd [#allocation5], 4294967040 }
  0x68   :  { %1029 = dma.done.wait [#allocation8], 2176  }
  0x69   :  { %1030 = vsyncadd [#allocation8], 4294965120 }
  0x6a   :  { %1031 = dma.done.wait [#allocation11], 2048  }
  0x6b   :  { %1032 = vsyncadd [#allocation11], 4294965248 }
  0x6c   :  { %1033 = dma.done.wait [#allocation14], 1024  }
  0x6d   :  { %1034 = vsyncadd [#allocation14], 4294966272  ;;  %v1047_v0 = vmov 0.0   ;;  %vm1048_vm0 = vmmov 0   ;;  %v829_v1 = vld [vmem:[#allocation7 + $0x40] sm:$0xff]   ;;  %v831_v3 = vld [vmem:[#allocation7 + $0x48] sm:$0xff]  }
  0x6e   :  { %752 = vmatprep.subr.bf16.mxu0 %v1047_v0  ;;  %768 = vmatprep.mubr.msk.bf16.mxu0 %vm1048_vm0, %v1047_v0  ;;  %v830_v2 = vld [vmem:[#allocation7] sm:$0xff]   ;;  %v832_v4 = vld [vmem:[#allocation7 + $0x8] sm:$0xff]   ;;  %v833_v5 = vld [vmem:[#allocation7 + $0x50] sm:$0xff]   ;;  %s1049_s5 = smov [#allocation15]  }
  0x6f   :  { %712 = vmatprep.subr.bf16.mxu1 %v829_v1  ;;  %v834_v6 = vld [vmem:[#allocation7 + $0x10] sm:$0xff]   ;;  %v835_v7 = vld [vmem:[#allocation7 + $0x58] sm:$0xff]   ;;  %v837_v9 = vld [vmem:[#allocation7 + $0x60] sm:$0xff]   ;;  %s645_s7 = sshll.u32 %s1049_s5, 4  ;;  %s646_s7 = int_to_ptr.vmem [resolvable:$true] %s645_s7 }
  0x70   :  { %713 = vmatpush3.bf16.msra.mxu1 %v830_v2  ;;  %v836_v8 = vld [vmem:[#allocation7 + $0x18] sm:$0xff]   ;;  %v838_v10 = vld [vmem:[#allocation7 + $0x20] sm:$0xff]   ;;  %v839_v11 = vld [vmem:[#allocation7 + $0x68] sm:$0xff]   ;;  %s1005_s8 = scalar_lea.vmem %s646_s7, 256  ;;  %p1010_p7 = scmp.lt.s32.totalorder %s646_s7, %s646_s7 }
  0x71   :  { %714 = vmatprep.subr.bf16.mxu1 %v831_v3  ;;  %v840_v12 = vld [vmem:[#allocation7 + $0x28] sm:$0xff]   ;;  %v847_v13 = vld [vmem:[#allocation4 + $0x4] ss:$8 sps:$4 sm:$0xff]   ;;  %v851_v21 = vld [vmem:[#allocation10 + $0x18] sm:$0xff]   ;;  %p1006_p6 = scmp.ne.s32.totalorder %s646_s7, %s1005_s8  ;;  %p1011_p8 = scmp.lt.s32.totalorder %s1005_s8, %s1005_s8 }
  0x72   :  { %v848_v14 = vld [vmem:[#allocation10] sm:$0xff]   ;;  %v841_v15 = vld [vmem:[#allocation7 + $0x70] sm:$0xff]   ;;  %402 = vmatprep.mubr.bf16.mxu1 %v847_v13  ;;  %v843_v18 = vld [vmem:[#allocation7 + $0x78] sm:$0xff]  }
  0x73   :  { %753 = vmatpush3.bf16.msra.mxu0 %v848_v14  ;;  %v849_v16 = vld [vmem:[#allocation10 + $0x8] sm:$0xff]   ;;  %v850_v19 = vld [vmem:[#allocation10 + $0x10] sm:$0xff]   ;;  %v852_v23 = vld [vmem:[#allocation10 + $0x20] sm:$0xff]   ;;  %p1012_p9 = por %p1011_p8, %p1010_p7 }
  0x74   :  { %715 = vmatpush3.bf16.msra.mxu1 %v832_v4  ;;  %754 = vmatprep.subr.bf16.mxu0 %v1047_v0  ;;  %v842_v17 = vld [vmem:[#allocation7 + $0x30] sm:$0xff]   ;;  %v844_v20 = vld [vmem:[#allocation7 + $0x38] sm:$0xff]   ;;  %v855_v26 = vld [vmem:[#allocation10 + $0x38] sm:$0xff]  }
  0x75   :  { %716 = vmatprep.subr.bf16.mxu1 %v833_v5  ;;  %v845_v22 = vld [vmem:[#allocation4] ss:$8 sps:$4 sm:$0xff]   ;;  %v856_v27 = vld [vmem:[#allocation9] sm:$0xff]   ;;  %v857_v28 = vld [vmem:[#allocation12] sm:$0xff]   ;;  %p1013_p10 = pnand %p1012_p9, %p1006_p6 }
  0x76   :  { %v853_v24 = vld [vmem:[#allocation10 + $0x28] sm:$0xff]   ;;  %v854_v25 = vld [vmem:[#allocation10 + $0x30] sm:$0xff]   ;;  %v860_v31 = vld [vmem:[#allocation12 + $0x18] sm:$0xff]  }
  0x77   :  { %755 = vmatpush3.bf16.msra.mxu0 %v849_v16  ;;  %v858_v29 = vld [vmem:[#allocation12 + $0x8] sm:$0xff]   ;;  %v859_v30 = vld [vmem:[#allocation12 + $0x10] sm:$0xff]   ;;  %v861_v32 = vld [vmem:[#allocation12 + $0x20] sm:$0xff]  }
  0x78   :  { %717 = vmatpush3.bf16.msra.mxu1 %v834_v6  ;;  %756 = vmatprep.subr.bf16.mxu0 %v1047_v0  ;;  %v862_v33 = vld [vmem:[#allocation12 + $0x28] sm:$0xff]   ;;  %v863_v34 = vld [vmem:[#allocation12 + $0x30] sm:$0xff]   ;;  %v864_v35 = vld [vmem:[#allocation12 + $0x38] sm:$0xff]  }
  0x79   :  { %718 = vmatprep.subr.bf16.mxu1 %v835_v7  ;;  %v865_v36 = vld [vmem:[#allocation13] sm:$0xff]   ;;  %v866_v37 = vld [vmem:[#allocation13 + $0x8] sm:$0xff]   ;;  %v867_v38 = vld [vmem:[#allocation13 + $0x10] sm:$0xff]  }
  0x7a   :  { %v868_v39 = vld [vmem:[#allocation13 + $0x18] sm:$0xff]   ;;  %v869_v40 = vld [vmem:[#allocation13 + $0x20] sm:$0xff]   ;;  %v870_v41 = vld [vmem:[#allocation13 + $0x28] sm:$0xff]  }
  0x7b   :  { %757 = vmatpush3.bf16.msra.mxu0 %v850_v19  ;;  %v871_v49 = vld [vmem:[#allocation13 + $0x30] sm:$0xff]   ;;  %v872_v50 = vld [vmem:[#allocation13 + $0x38] sm:$0xff]  }
  0x7c   :  { %719 = vmatpush3.bf16.msra.mxu1 %v836_v8  ;;  %758 = vmatprep.subr.bf16.mxu0 %v1047_v0 }
  0x7d   :  { %720 = vmatprep.subr.bf16.mxu1 %v837_v9 }
  0x7f   :  { %759 = vmatpush3.bf16.msra.mxu0 %v851_v21 }
  0x80   :  { %721 = vmatpush3.bf16.msra.mxu1 %v838_v10  ;;  %760 = vmatprep.subr.bf16.mxu0 %v1047_v0 }
  0x81   :  { %722 = vmatprep.subr.bf16.mxu1 %v839_v11 }
  0x83   :  { %761 = vmatpush3.bf16.msra.mxu0 %v852_v23 }
  0x84   :  { %723 = vmatpush3.bf16.msra.mxu1 %v840_v12  ;;  %762 = vmatprep.subr.bf16.mxu0 %v1047_v0 }
  0x85   :  { %724 = vmatprep.subr.bf16.mxu1 %v841_v15 }
  0x87   :  { %763 = vmatpush3.bf16.msra.mxu0 %v853_v24 }
  0x88   :  { %725 = vmatpush3.bf16.msra.mxu1 %v842_v17  ;;  %764 = vmatprep.subr.bf16.mxu0 %v1047_v0 }
  0x89   :  { %726 = vmatprep.subr.bf16.mxu1 %v843_v18 }
  0x8b   :  { %765 = vmatpush3.bf16.msra.mxu0 %v854_v25 }
  0x8c   :  { %727 = vmatpush3.bf16.msra.mxu1 %v844_v20  ;;  %766 = vmatprep.subr.bf16.mxu0 %v1047_v0 }
  0x8d   :  { %792 = vmatprep.subr.bf16.mxu1 %v1047_v0 }
  0x8f   :  { %403 = vmatmul.mubr.bf16.vlgmr.msra.gmra.mrb[0].mxu1 %v845_v22  ;;  %767 = vmatpush3.bf16.msra.mxu0 %v855_v26 }
  0x90   :  { %808 = vmatprep.mubr.msk.bf16.mxu1 %vm1048_vm0, %v1047_v0  ;;  %772 = vmatprep.subr.bf16.mxu0 %v1047_v0 }
  0x91   :  { %793 = vmatpush3.bf16.msra.mxu1 %v865_v36 }
  0x92   :  { %769 = vmatmul.mubr.bf16.vlgmr.msra.gmra.mrb[0].mxu0 %v856_v27  ;;  %794 = vmatprep.subr.bf16.mxu1 %v1047_v0 }
  0x93   :  { %773 = vmatpush3.bf16.msra.mxu0 %v857_v28  ;;  %788 = vmatprep.mubr.msk.bf16.mxu0 %vm1048_vm0, %v1047_v0 }
  0x94   :  { %774 = vmatprep.subr.bf16.mxu0 %v1047_v0 }
  0x95   :  { %795 = vmatpush3.bf16.msra.mxu1 %v866_v37 }
  0x96   :  { %796 = vmatprep.subr.bf16.mxu1 %v1047_v0 }
  0x97   :  { %775 = vmatpush3.bf16.msra.mxu0 %v858_v29 }
  0x98   :  { %776 = vmatprep.subr.bf16.mxu0 %v1047_v0 }
  0x99   :  { %797 = vmatpush3.bf16.msra.mxu1 %v867_v38 }
  0x9a   :  { %798 = vmatprep.subr.bf16.mxu1 %v1047_v0 }
  0x9b   :  { %777 = vmatpush3.bf16.msra.mxu0 %v859_v30 }
  0x9c   :  { %778 = vmatprep.subr.bf16.mxu0 %v1047_v0 }
  0x9d   :  { %799 = vmatpush3.bf16.msra.mxu1 %v868_v39 }
  0x9e   :  { %800 = vmatprep.subr.bf16.mxu1 %v1047_v0 }
  0x9f   :  { %779 = vmatpush3.bf16.msra.mxu0 %v860_v31 }
  0xa0   :  { %780 = vmatprep.subr.bf16.mxu0 %v1047_v0 }
  0xa1   :  { %801 = vmatpush3.bf16.msra.mxu1 %v869_v40 }
  0xa2   :  { %802 = vmatprep.subr.bf16.mxu1 %v1047_v0 }
  0xa3   :  { %781 = vmatpush3.bf16.msra.mxu0 %v861_v32 }
  0xa4   :  { %782 = vmatprep.subr.bf16.mxu0 %v1047_v0 }
  0xa5   :  { %803 = vmatpush3.bf16.msra.mxu1 %v870_v41 }
  0xa6   :  { %804 = vmatprep.subr.bf16.mxu1 %v1047_v0 }
  0xa7   :  { %783 = vmatpush3.bf16.msra.mxu0 %v862_v33 }
  0xa8   :  { %784 = vmatprep.subr.bf16.mxu0 %v1047_v0 }
  0xa9   :  { %805 = vmatpush3.bf16.msra.mxu1 %v871_v49 }
  0xaa   :  { %806 = vmatprep.subr.bf16.mxu1 %v1047_v0 }
  0xab   :  { %785 = vmatpush3.bf16.msra.mxu0 %v863_v34 }
  0xac   :  { %786 = vmatprep.subr.bf16.mxu0 %v1047_v0 }
  0xad   :  { %807 = vmatpush3.bf16.msra.mxu1 %v872_v50 }
  0xaf   :  { %787 = vmatpush3.bf16.msra.mxu0 %v864_v35 }
 0x162   :  { %v728_v42 = vpop.f32.mrb[0].mxu1 }
 0x163   :  { %v729_v43 = vpop.f32.mrb[1].mxu1 }
 0x164   :  { %v730_v44 = vadd.f32 %v729_v43, %v728_v42  ;;  %v731_v45 = vpop.f32.mrb[2].mxu1 }
 0x165   :  { %v732_v46 = vpop.f32.mrb[3].mxu1 }
 0x166   :  { %v733_v47 = vadd.f32 %v732_v46, %v731_v45 }
 0x168   :  { %v420_v48 = vpack.c.bf16 %v733_v47, %v730_v44 }
 0x16a   :  { %789 = vmatmul.mubr.bf16.vlgmr.msra.gmra.mrb[0].mxu0 %v420_v48 }
 0x23d   :  { %v521_v51 = vpop.f32.mrb[0].mxu0 }
 0x23e   :  { %v790_v52 = vpop.f32.mrb[1].mxu0  ;;  %v530_v54 = vmax.f32 %v521_v51, 0.0 }
 0x23f   :  { %v524_v53 = vpop.f32.mrb[2].mxu0 }
 0x240   :  { %v531_v55 = vmax.f32 %v524_v53, 0.0  ;;  %v791_v56 = vpop.f32.mrb[3].mxu0 }
 0x242   :  { %v532_v57 = vpack.c.bf16 %v531_v55, %v530_v54 }
 0x244   :  { %809 = vmatmul.mubr.bf16.vlgmr.msra.gmra.mrb[4].mxu1 %v532_v57 }
 0x317   :  { %v631_v58 = vpop.f32.mrb[4].mxu1 }
 0x318   :  { %638 = vst [vmem:[#allocation15] sm:$0xff] %v631_v58  ;;  %v810_v59 = vpop.f32.mrb[5].mxu1 }
 0x319   :  { %v634_v60 = vpop.f32.mrb[6].mxu1 }
 0x31a   :  { %639 = vst [vmem:[#allocation15 + $0x8] sm:$0xff] %v634_v60  ;;  %v811_v61 = vpop.f32.mrb[7].mxu1 }
 0x31b   :  { %1016 = shalt.err (!%p1013_p10)
}
 0x31c   :  { %s1017_s24 = scalar_lea.hbm %s1226_s6, 256 }
 0x31d   :  { %p1018_p11 = scmp.ne.s32.totalorder %s1226_s6, %s1017_s24  ;;  %p1021_p12 = scmp.lt.u32.totalorder %s1017_s24, %s1226_s6 }
 0x31f   :  { %p1023_p13 = pnand %p1021_p12, %p1018_p11 }
 0x321   :  { %1026 = shalt.err (!%p1023_p13)
}
 0x322   :  { %651 = dma.vmem_to_hbm [thread:$0]  %s646_s7, 256, %s1226_s6, [#allocation6], %s1042_s3, %s1042_s3, %s1043_s10  }
 0x323   :  { %1035 = dma.done.wait [#allocation6], 256  }
 0x324   :  { %1036 = vsyncadd [#allocation6], 4294967040 }
 0x325   :  { %655 = vsyncpa [#allocation5], 1 }
 0x326   :  { %656 = vsyncpa [#allocation8], 1 }
 0x327   :  { %657 = vsyncpa [#allocation11], 1 }
 0x328   :  { %658 = vsyncpa [#allocation14], 1 }
 0x329   :  { %659 = vsyncpa [#allocation6], 1 }

// kernel: tpu_custom_call.1
= control target key start
LH: loop header
LB: loop body
LE: loop exit
PB: predicated region body
PF: predicated region fallthrough
CT: control target
= control target key end

     0   :  { %11 = vsyncpa [#allocation5], 0  ;;  %s1220_s0 = inlined_call_operand.hbm [shape: bf16[16,256], index: 0, kind: input, shape index: {}]   ;;  %s1221_s1 = inlined_call_operand.hbm [shape: bf16[256,128], index: 1, kind: input, shape index: {}]   ;;  %s1222_s2 = inlined_call_operand.hbm [shape: bf16[16,128], index: 2, kind: input, shape index: {}]   ;;  %s1223_s3 = inlined_call_operand.hbm [shape: bf16[128,128], index: 3, kind: input, shape index: {}]   ;;  %s1224_s4 = inlined_call_operand.hbm [shape: bf16[128,128], index: 4, kind: input, shape index: {}]   ;;  %s1225_s5 = inlined_call_operand.hbm [shape: bf16[128,128], index: 5, kind: input, shape index: {}]   ;;  %s1226_s6 = inlined_call_operand.hbm [shape: f32[16,128], index: 6, kind: output, shape index: {}]  }
   0x1   :  { %12 = vsyncpa [#allocation8], 0 }
   0x2   :  { %13 = vsyncpa [#allocation11], 0 }
   0x3   :  { %14 = vsyncpa [#allocation14], 0 }
   0x4   :  { %15 = vsyncpa [#allocation6], 0  ;;  %s1037_s21 = smov [#allocation7]   ;;  %s873_s25 = scalar_lea.hbm %s1221_s1, 2048 }
   0x5   :  { %s33_s22 = sshll.u32 %s1037_s21, 4  ;;  %p874_p0 = scmp.ne.s32.totalorder %s1221_s1, %s873_s25  ;;  %s34_s22 = int_to_ptr.vmem [resolvable:$true] %s33_s22 }
   0x6   :  { %p877_p1 = scmp.lt.u32.totalorder %s873_s25, %s1221_s1 }
   0x8   :  { %p879_p2 = pnand %p877_p1, %p874_p0 }
   0xa   :  { %882 = shalt.err (!%p879_p2)
}
   0xb   :  { %s883_s30 = scalar_lea.vmem %s34_s22, 2048  ;;  %p888_p4 = scmp.lt.s32.totalorder %s34_s22, %s34_s22 }
   0xc   :  { %p884_p3 = scmp.ne.s32.totalorder %s34_s22, %s883_s30  ;;  %p889_p5 = scmp.lt.s32.totalorder %s883_s30, %s883_s30 }
   0xe   :  { %p890_p6 = por %p889_p5, %p888_p4 }
  0x10   :  { %p891_p7 = pnand %p890_p6, %p884_p3 }
  0x12   :  { %894 = shalt.err (!%p891_p7)
}
  0x13   :  { %s1038_s7 = smov 64   ;;  %s1039_s8 = smov 4  }
  0x14   :  { %39 = dma.hbm_to_vmem [thread:$0]  %s1221_s1, 2048, %s34_s22, [#allocation8], %s1038_s7, %s1038_s7, %s1039_s8  }
  0x15   :  { %s1040_s11 = smov [#allocation10]   ;;  %s1041_s13 = smov [#allocation4]  }
  0x16   :  { %s57_s12 = sshll.u32 %s1040_s11, 4  ;;  %s21_s14 = sshll.u32 %s1041_s13, 4  ;;  %s58_s12 = int_to_ptr.vmem [resolvable:$true] %s57_s12  ;;  %s22_s14 = int_to_ptr.vmem [resolvable:$true] %s21_s14 }
  0x17   :  { %s895_s17 = scalar_lea.hbm %s1223_s3, 1024 }
  0x18   :  { %p896_p8 = scmp.ne.s32.totalorder %s1223_s3, %s895_s17  ;;  %p899_p9 = scmp.lt.u32.totalorder %s895_s17, %s1223_s3 }
  0x1a   :  { %p901_p10 = pnand %p899_p9, %p896_p8 }
  0x1c   :  { %904 = shalt.err (!%p901_p10)
}
  0x1d   :  { %s905_s1 = scalar_lea.vmem %s58_s12, 1024  ;;  %p910_p12 = scmp.lt.s32.totalorder %s58_s12, %s58_s12 }
  0x1e   :  { %p906_p11 = scmp.ne.s32.totalorder %s58_s12, %s905_s1  ;;  %p911_p13 = scmp.lt.s32.totalorder %s905_s1, %s905_s1 }
  0x20   :  { %p912_p0 = por %p911_p13, %p910_p12 }
  0x22   :  { %p913_p1 = pnand %p912_p0, %p906_p11 }
  0x24   :  { %916 = shalt.err (!%p913_p1)
}
  0x25   :  { %63 = dma.hbm_to_vmem [thread:$0]  %s1223_s3, 1024, %s58_s12, [#allocation11], %s1038_s7, %s1038_s7, %s1039_s8  }
  0x26   :  { %s917_s26 = scalar_lea.hbm %s1220_s0, 256 }
  0x27   :  { %p918_p2 = scmp.ne.s32.totalorder %s1220_s0, %s917_s26  ;;  %p921_p3 = scmp.lt.u32.totalorder %s917_s26, %s1220_s0 }
  0x29   :  { %p923_p4 = pnand %p921_p3, %p918_p2 }
  0x2b   :  { %926 = shalt.err (!%p923_p4)
}
  0x2c   :  { %s927_s9 = scalar_lea.vmem %s22_s14, 256  ;;  %p932_p6 = scmp.lt.s32.totalorder %s22_s14, %s22_s14 }
  0x2d   :  { %p928_p5 = scmp.ne.s32.totalorder %s22_s14, %s927_s9  ;;  %p933_p7 = scmp.lt.s32.totalorder %s927_s9, %s927_s9 }
  0x2f   :  { %p934_p8 = por %p933_p7, %p932_p6 }
  0x31   :  { %p935_p9 = pnand %p934_p8, %p928_p5 }
  0x33   :  { %938 = shalt.err (!%p935_p9)
}
  0x34   :  { %s1042_s3 = smov 128   ;;  %s1043_s10 = smov 8  }
  0x35   :  { %27 = dma.hbm_to_vmem [thread:$0]  %s1220_s0, 256, %s22_s14, [#allocation5], %s1042_s3, %s1042_s3, %s1043_s10  }
  0x36   :  { %s1044_s13 = smov [#allocation9]   ;;  %s1045_s16 = smov [#allocation12]  }
  0x37   :  { %s45_s15 = sshll.u32 %s1044_s13, 4  ;;  %s69_s17 = sshll.u32 %s1045_s16, 4  ;;  %s46_s15 = int_to_ptr.vmem [resolvable:$true] %s45_s15  ;;  %s70_s17 = int_to_ptr.vmem [resolvable:$true] %s69_s17 }
  0x38   :  { %s939_s20 = scalar_lea.hbm %s1222_s2, 128 }
  0x39   :  { %p940_p10 = scmp.ne.s32.totalorder %s1222_s2, %s939_s20  ;;  %p943_p11 = scmp.lt.u32.totalorder %s939_s20, %s1222_s2 }
  0x3b   :  { %p945_p12 = pnand %p943_p11, %p940_p10 }
  0x3d   :  { %948 = shalt.err (!%p945_p12)
}
  0x3e   :  { %s949_s0 = scalar_lea.vmem %s46_s15, 128  ;;  %p954_p0 = scmp.lt.s32.totalorder %s46_s15, %s46_s15 }
  0x3f   :  { %p950_p13 = scmp.ne.s32.totalorder %s46_s15, %s949_s0  ;;  %p955_p1 = scmp.lt.s32.totalorder %s949_s0, %s949_s0 }
  0x41   :  { %p956_p2 = por %p955_p1, %p954_p0 }
  0x43   :  { %p957_p3 = pnand %p956_p2, %p950_p13 }
  0x45   :  { %960 = shalt.err (!%p957_p3)
}
  0x46   :  { %51 = dma.hbm_to_vmem [thread:$0]  %s1222_s2, 128, %s46_s15, [#allocation8], %s1038_s7, %s1038_s7, %s1039_s8  }
  0x47   :  { %s961_s27 = scalar_lea.hbm %s1224_s4, 1024 }
  0x48   :  { %p962_p4 = scmp.ne.s32.totalorder %s1224_s4, %s961_s27  ;;  %p965_p5 = scmp.lt.u32.totalorder %s961_s27, %s1224_s4 }
  0x4a   :  { %p967_p6 = pnand %p965_p5, %p962_p4 }
  0x4c   :  { %970 = shalt.err (!%p967_p6)
}
  0x4d   :  { %s971_s11 = scalar_lea.vmem %s70_s17, 1024  ;;  %p976_p8 = scmp.lt.s32.totalorder %s70_s17, %s70_s17 }
  0x4e   :  { %p972_p7 = scmp.ne.s32.totalorder %s70_s17, %s971_s11  ;;  %p977_p9 = scmp.lt.s32.totalorder %s971_s11, %s971_s11 }
  0x50   :  { %p978_p10 = por %p977_p9, %p976_p8 }
  0x52   :  { %p979_p11 = pnand %p978_p10, %p972_p7 }
  0x54   :  { %982 = shalt.err (!%p979_p11)
}
  0x55   :  { %75 = dma.hbm_to_vmem [thread:$0]  %s1224_s4, 1024, %s70_s17, [#allocation11], %s1038_s7, %s1038_s7, %s1039_s8  }
  0x56   :  { %s1046_s13 = smov [#allocation13]   ;;  %s983_s19 = scalar_lea.hbm %s1225_s5, 1024 }
  0x57   :  { %s81_s15 = sshll.u32 %s1046_s13, 4  ;;  %p984_p12 = scmp.ne.s32.totalorder %s1225_s5, %s983_s19  ;;  %s82_s15 = int_to_ptr.vmem [resolvable:$true] %s81_s15 }
  0x58   :  { %p987_p13 = scmp.lt.u32.totalorder %s983_s19, %s1225_s5 }
  0x5a   :  { %p989_p0 = pnand %p987_p13, %p984_p12 }
  0x5c   :  { %992 = shalt.err (!%p989_p0)
}
  0x5d   :  { %s993_s23 = scalar_lea.vmem %s82_s15, 1024  ;;  %p998_p2 = scmp.lt.s32.totalorder %s82_s15, %s82_s15 }
  0x5e   :  { %p994_p1 = scmp.ne.s32.totalorder %s82_s15, %s993_s23  ;;  %p999_p3 = scmp.lt.s32.totalorder %s993_s23, %s993_s23 }
  0x60   :  { %p1000_p4 = por %p999_p3, %p998_p2 }
  0x62   :  { %p1001_p5 = pnand %p1000_p4, %p994_p1 }
  0x64   :  { %1004 = shalt.err (!%p1001_p5)
}
  0x65   :  { %87 = dma.hbm_to_vmem [thread:$0]  %s1225_s5, 1024, %s82_s15, [#allocation14], %s1038_s7, %s1038_s7, %s1039_s8  }
  0x66   :  { %1027 = dma.done.wait [#allocation5], 256  }
  0x67   :  { %1028 = vsyncadd [#allocation5], 4294967040 }
  0x68   :  { %1029 = dma.done.wait [#allocation8], 2176  }
  0x69   :  { %1030 = vsyncadd [#allocation8], 4294965120 }
  0x6a   :  { %1031 = dma.done.wait [#allocation11], 2048  }
  0x6b   :  { %1032 = vsyncadd [#allocation11], 4294965248 }
  0x6c   :  { %1033 = dma.done.wait [#allocation14], 1024  }
  0x6d   :  { %1034 = vsyncadd [#allocation14], 4294966272  ;;  %v1047_v0 = vmov 0.0   ;;  %vm1048_vm0 = vmmov 0   ;;  %v829_v1 = vld [vmem:[#allocation7 + $0x40] sm:$0xff]   ;;  %v831_v3 = vld [vmem:[#allocation7 + $0x48] sm:$0xff]  }
  0x6e   :  { %752 = vmatprep.subr.bf16.mxu0 %v1047_v0  ;;  %768 = vmatprep.mubr.msk.bf16.mxu0 %vm1048_vm0, %v1047_v0  ;;  %v830_v2 = vld [vmem:[#allocation7] sm:$0xff]   ;;  %v832_v4 = vld [vmem:[#allocation7 + $0x8] sm:$0xff]   ;;  %v833_v5 = vld [vmem:[#allocation7 + $0x50] sm:$0xff]   ;;  %s1049_s5 = smov [#allocation15]  }
  0x6f   :  { %712 = vmatprep.subr.bf16.mxu1 %v829_v1  ;;  %v834_v6 = vld [vmem:[#allocation7 + $0x10] sm:$0xff]   ;;  %v835_v7 = vld [vmem:[#allocation7 + $0x58] sm:$0xff]   ;;  %v837_v9 = vld [vmem:[#allocation7 + $0x60] sm:$0xff]   ;;  %s645_s7 = sshll.u32 %s1049_s5, 4  ;;  %s646_s7 = int_to_ptr.vmem [resolvable:$true] %s645_s7 }
  0x70   :  { %713 = vmatpush3.bf16.msra.mxu1 %v830_v2  ;;  %v836_v8 = vld [vmem:[#allocation7 + $0x18] sm:$0xff]   ;;  %v838_v10 = vld [vmem:[#allocation7 + $0x20] sm:$0xff]   ;;  %v839_v11 = vld [vmem:[#allocation7 + $0x68] sm:$0xff]   ;;  %s1005_s8 = scalar_lea.vmem %s646_s7, 256  ;;  %p1010_p7 = scmp.lt.s32.totalorder %s646_s7, %s646_s7 }
  0x71   :  { %714 = vmatprep.subr.bf16.mxu1 %v831_v3  ;;  %v840_v12 = vld [vmem:[#allocation7 + $0x28] sm:$0xff]   ;;  %v847_v13 = vld [vmem:[#allocation4 + $0x4] ss:$8 sps:$4 sm:$0xff]   ;;  %v851_v21 = vld [vmem:[#allocation10 + $0x18] sm:$0xff]   ;;  %p1006_p6 = scmp.ne.s32.totalorder %s646_s7, %s1005_s8  ;;  %p1011_p8 = scmp.lt.s32.totalorder %s1005_s8, %s1005_s8 }
  0x72   :  { %v848_v14 = vld [vmem:[#allocation10] sm:$0xff]   ;;  %v841_v15 = vld [vmem:[#allocation7 + $0x70] sm:$0xff]   ;;  %402 = vmatprep.mubr.bf16.mxu1 %v847_v13  ;;  %v843_v18 = vld [vmem:[#allocation7 + $0x78] sm:$0xff]  }
  0x73   :  { %753 = vmatpush3.bf16.msra.mxu0 %v848_v14  ;;  %v849_v16 = vld [vmem:[#allocation10 + $0x8] sm:$0xff]   ;;  %v850_v19 = vld [vmem:[#allocation10 + $0x10] sm:$0xff]   ;;  %v852_v23 = vld [vmem:[#allocation10 + $0x20] sm:$0xff]   ;;  %p1012_p9 = por %p1011_p8, %p1010_p7 }
  0x74   :  { %715 = vmatpush3.bf16.msra.mxu1 %v832_v4  ;;  %754 = vmatprep.subr.bf16.mxu0 %v1047_v0  ;;  %v842_v17 = vld [vmem:[#allocation7 + $0x30] sm:$0xff]   ;;  %v844_v20 = vld [vmem:[#allocation7 + $0x38] sm:$0xff]   ;;  %v855_v26 = vld [vmem:[#allocation10 + $0x38] sm:$0xff]  }
  0x75   :  { %716 = vmatprep.subr.bf16.mxu1 %v833_v5  ;;  %v845_v22 = vld [vmem:[#allocation4] ss:$8 sps:$4 sm:$0xff]   ;;  %v856_v27 = vld [vmem:[#allocation9] sm:$0xff]   ;;  %v857_v28 = vld [vmem:[#allocation12] sm:$0xff]   ;;  %p1013_p10 = pnand %p1012_p9, %p1006_p6 }
  0x76   :  { %v853_v24 = vld [vmem:[#allocation10 + $0x28] sm:$0xff]   ;;  %v854_v25 = vld [vmem:[#allocation10 + $0x30] sm:$0xff]   ;;  %v860_v31 = vld [vmem:[#allocation12 + $0x18] sm:$0xff]  }
  0x77   :  { %755 = vmatpush3.bf16.msra.mxu0 %v849_v16  ;;  %v858_v29 = vld [vmem:[#allocation12 + $0x8] sm:$0xff]   ;;  %v859_v30 = vld [vmem:[#allocation12 + $0x10] sm:$0xff]   ;;  %v861_v32 = vld [vmem:[#allocation12 + $0x20] sm:$0xff]  }
  0x78   :  { %717 = vmatpush3.bf16.msra.mxu1 %v834_v6  ;;  %756 = vmatprep.subr.bf16.mxu0 %v1047_v0  ;;  %v862_v33 = vld [vmem:[#allocation12 + $0x28] sm:$0xff]   ;;  %v863_v34 = vld [vmem:[#allocation12 + $0x30] sm:$0xff]   ;;  %v864_v35 = vld [vmem:[#allocation12 + $0x38] sm:$0xff]  }
  0x79   :  { %718 = vmatprep.subr.bf16.mxu1 %v835_v7  ;;  %v865_v36 = vld [vmem:[#allocation13] sm:$0xff]   ;;  %v866_v37 = vld [vmem:[#allocation13 + $0x8] sm:$0xff]   ;;  %v867_v38 = vld [vmem:[#allocation13 + $0x10] sm:$0xff]  }
  0x7a   :  { %v868_v39 = vld [vmem:[#allocation13 + $0x18] sm:$0xff]   ;;  %v869_v40 = vld [vmem:[#allocation13 + $0x20] sm:$0xff]   ;;  %v870_v41 = vld [vmem:[#allocation13 + $0x28] sm:$0xff]  }
  0x7b   :  { %757 = vmatpush3.bf16.msra.mxu0 %v850_v19  ;;  %v871_v49 = vld [vmem:[#allocation13 + $0x30] sm:$0xff]   ;;  %v872_v50 = vld [vmem:[#allocation13 + $0x38] sm:$0xff]  }
  0x7c   :  { %719 = vmatpush3.bf16.msra.mxu1 %v836_v8  ;;  %758 = vmatprep.subr.bf16.mxu0 %v1047_v0 }
  0x7d   :  { %720 = vmatprep.subr.bf16.mxu1 %v837_v9 }
  0x7f   :  { %759 = vmatpush3.bf16.msra.mxu0 %v851_v21 }
  0x80   :  { %721 = vmatpush3.bf16.msra.mxu1 %v838_v10  ;;  %760 = vmatprep.subr.bf16.mxu0 %v1047_v0 }
  0x81   :  { %722 = vmatprep.subr.bf16.mxu1 %v839_v11 }
  0x83   :  { %761 = vmatpush3.bf16.msra.mxu0 %v852_v23 }
  0x84   :  { %723 = vmatpush3.bf16.msra.mxu1 %v840_v12  ;;  %762 = vmatprep.subr.bf16.mxu0 %v1047_v0 }
  0x85   :  { %724 = vmatprep.subr.bf16.mxu1 %v841_v15 }
  0x87   :  { %763 = vmatpush3.bf16.msra.mxu0 %v853_v24 }
  0x88   :  { %725 = vmatpush3.bf16.msra.mxu1 %v842_v17  ;;  %764 = vmatprep.subr.bf16.mxu0 %v1047_v0 }
  0x89   :  { %726 = vmatprep.subr.bf16.mxu1 %v843_v18 }
  0x8b   :  { %765 = vmatpush3.bf16.msra.mxu0 %v854_v25 }
  0x8c   :  { %727 = vmatpush3.bf16.msra.mxu1 %v844_v20  ;;  %766 = vmatprep.subr.bf16.mxu0 %v1047_v0 }
  0x8d   :  { %792 = vmatprep.subr.bf16.mxu1 %v1047_v0 }
  0x8f   :  { %403 = vmatmul.mubr.bf16.vlgmr.msra.gmra.mrb[0].mxu1 %v845_v22  ;;  %767 = vmatpush3.bf16.msra.mxu0 %v855_v26 }
  0x90   :  { %808 = vmatprep.mubr.msk.bf16.mxu1 %vm1048_vm0, %v1047_v0  ;;  %772 = vmatprep.subr.bf16.mxu0 %v1047_v0 }
  0x91   :  { %793 = vmatpush3.bf16.msra.mxu1 %v865_v36 }
  0x92   :  { %769 = vmatmul.mubr.bf16.vlgmr.msra.gmra.mrb[0].mxu0 %v856_v27  ;;  %794 = vmatprep.subr.bf16.mxu1 %v1047_v0 }
  0x93   :  { %773 = vmatpush3.bf16.msra.mxu0 %v857_v28  ;;  %788 = vmatprep.mubr.msk.bf16.mxu0 %vm1048_vm0, %v1047_v0 }
  0x94   :  { %774 = vmatprep.subr.bf16.mxu0 %v1047_v0 }
  0x95   :  { %795 = vmatpush3.bf16.msra.mxu1 %v866_v37 }
  0x96   :  { %796 = vmatprep.subr.bf16.mxu1 %v1047_v0 }
  0x97   :  { %775 = vmatpush3.bf16.msra.mxu0 %v858_v29 }
  0x98   :  { %776 = vmatprep.subr.bf16.mxu0 %v1047_v0 }
  0x99   :  { %797 = vmatpush3.bf16.msra.mxu1 %v867_v38 }
  0x9a   :  { %798 = vmatprep.subr.bf16.mxu1 %v1047_v0 }
  0x9b   :  { %777 = vmatpush3.bf16.msra.mxu0 %v859_v30 }
  0x9c   :  { %778 = vmatprep.subr.bf16.mxu0 %v1047_v0 }
  0x9d   :  { %799 = vmatpush3.bf16.msra.mxu1 %v868_v39 }
  0x9e   :  { %800 = vmatprep.subr.bf16.mxu1 %v1047_v0 }
  0x9f   :  { %779 = vmatpush3.bf16.msra.mxu0 %v860_v31 }
  0xa0   :  { %780 = vmatprep.subr.bf16.mxu0 %v1047_v0 }
  0xa1   :  { %801 = vmatpush3.bf16.msra.mxu1 %v869_v40 }
  0xa2   :  { %802 = vmatprep.subr.bf16.mxu1 %v1047_v0 }
  0xa3   :  { %781 = vmatpush3.bf16.msra.mxu0 %v861_v32 }
  0xa4   :  { %782 = vmatprep.subr.bf16.mxu0 %v1047_v0 }
  0xa5   :  { %803 = vmatpush3.bf16.msra.mxu1 %v870_v41 }
  0xa6   :  { %804 = vmatprep.subr.bf16.mxu1 %v1047_v0 }
  0xa7   :  { %783 = vmatpush3.bf16.msra.mxu0 %v862_v33 }
  0xa8   :  { %784 = vmatprep.subr.bf16.mxu0 %v1047_v0 }
  0xa9   :  { %805 = vmatpush3.bf16.msra.mxu1 %v871_v49 }
  0xaa   :  { %806 = vmatprep.subr.bf16.mxu1 %v1047_v0 }
  0xab   :  { %785 = vmatpush3.bf16.msra.mxu0 %v863_v34 }
  0xac   :  { %786 = vmatprep.subr.bf16.mxu0 %v1047_v0 }
  0xad   :  { %807 = vmatpush3.bf16.msra.mxu1 %v872_v50 }
  0xaf   :  { %787 = vmatpush3.bf16.msra.mxu0 %v864_v35 }
 0x162   :  { %v728_v42 = vpop.f32.mrb[0].mxu1 }
 0x163   :  { %v729_v43 = vpop.f32.mrb[1].mxu1 }
 0x164   :  { %v730_v44 = vadd.f32 %v729_v43, %v728_v42  ;;  %v731_v45 = vpop.f32.mrb[2].mxu1 }
 0x165   :  { %v732_v46 = vpop.f32.mrb[3].mxu1 }
 0x166   :  { %v733_v47 = vadd.f32 %v732_v46, %v731_v45 }
 0x168   :  { %v420_v48 = vpack.c.bf16 %v733_v47, %v730_v44 }
 0x16a   :  { %789 = vmatmul.mubr.bf16.vlgmr.msra.gmra.mrb[0].mxu0 %v420_v48 }
 0x23d   :  { %v521_v51 = vpop.f32.mrb[0].mxu0 }
 0x23e   :  { %v790_v52 = vpop.f32.mrb[1].mxu0  ;;  %v530_v54 = vmax.f32 %v521_v51, 0.0 }
 0x23f   :  { %v524_v53 = vpop.f32.mrb[2].mxu0 }
 0x240   :  { %v531_v55 = vmax.f32 %v524_v53, 0.0  ;;  %v791_v56 = vpop.f32.mrb[3].mxu0 }
 0x242   :  { %v532_v57 = vpack.c.bf16 %v531_v55, %v530_v54 }
 0x244   :  { %809 = vmatmul.mubr.bf16.vlgmr.msra.gmra.mrb[4].mxu1 %v532_v57 }
 0x317   :  { %v631_v58 = vpop.f32.mrb[4].mxu1 }
 0x318   :  { %638 = vst [vmem:[#allocation15] sm:$0xff] %v631_v58  ;;  %v810_v59 = vpop.f32.mrb[5].mxu1 }
 0x319   :  { %v634_v60 = vpop.f32.mrb[6].mxu1 }
 0x31a   :  { %639 = vst [vmem:[#allocation15 + $0x8] sm:$0xff] %v634_v60  ;;  %v811_v61 = vpop.f32.mrb[7].mxu1 }
 0x31b   :  { %1016 = shalt.err (!%p1013_p10)
}
 0x31c   :  { %s1017_s24 = scalar_lea.hbm %s1226_s6, 256 }
 0x31d   :  { %p1018_p11 = scmp.ne.s32.totalorder %s1226_s6, %s1017_s24  ;;  %p1021_p12 = scmp.lt.u32.totalorder %s1017_s24, %s1226_s6 }
 0x31f   :  { %p1023_p13 = pnand %p1021_p12, %p1018_p11 }
 0x321   :  { %1026 = shalt.err (!%p1023_p13)
}
 0x322   :  { %651 = dma.vmem_to_hbm [thread:$0]  %s646_s7, 256, %s1226_s6, [#allocation6], %s1042_s3, %s1042_s3, %s1043_s10  }
 0x323   :  { %1035 = dma.done.wait [#allocation6], 256  }
 0x324   :  { %1036 = vsyncadd [#allocation6], 4294967040 }
 0x325   :  { %655 = vsyncpa [#allocation5], 1 }
 0x326   :  { %656 = vsyncpa [#allocation8], 1 }
 0x327   :  { %657 = vsyncpa [#allocation11], 1 }
 0x328   :  { %658 = vsyncpa [#allocation14], 1 }
 0x329   :  { %659 = vsyncpa [#allocation6], 1 }

</bundles_post_ra>
